<compile_context>
chip_gen: v7x
topology: tpu7x:2x2x1
jax: 0.10.0
libtpu: 0.0.40
codegen_flags: <defaults>
</compile_context>

<pallas_src>
import jax
import jax.numpy as jnp
from jax.experimental import pallas as pl
from jax.experimental.pallas import tpu as pltpu

STATE_DIM = 2
HIDDEN = 128
ACTION_DIM = 4


def policy_kernel(xT_ref, w1_ref, b1_ref, w2_ref, b2_ref, outT_ref):
    # Batch-on-lanes layout: every tensor here is [features, batch_tile].
    xT = xT_ref[...]                                   # [STATE_DIM, TM]

    # affine1 + ReLU on the VPU: K=2 contraction as two broadcast mul-adds.
    # w1 is the PyTorch (HIDDEN, STATE_DIM) weight, b1 is (HIDDEN, 1).
    hT = (w1_ref[:, 0:1] * xT[0:1, :]
          + w1_ref[:, 1:2] * xT[1:2, :]
          + b1_ref[...])                               # [HIDDEN, TM]
    hT = jnp.maximum(hT, 0.0)

    # affine2 on the MXU: scores_T = W2 @ hT + b2 -> [ACTION_DIM, TM]
    sT = (jnp.dot(w2_ref[...], hT, preferred_element_type=jnp.float32)
          + b2_ref[...])

    # Softmax over the ACTION_DIM=4 sublanes (axis 0), numerically stable,
    # using explicit sublane-slice max/adds (VPU) instead of lane reductions.
    m = jnp.maximum(jnp.maximum(sT[0:1, :], sT[1:2, :]),
                    jnp.maximum(sT[2:3, :], sT[3:4, :]))
    e = jnp.exp(sT - m)
    denom = e[0:1, :] + e[1:2, :] + e[2:3, :] + e[3:4, :]
    # Exact divide so rows sum to 1 to f32 precision (the approx reciprocal
    # previously broke the sum-to-one check and saved nothing here).
    outT_ref[...] = (e / denom).astype(outT_ref.dtype)


def _round_up(n, m):
    return ((n + m - 1) // m) * m


def policy_forward(x, w1, b1, w2, b2, *, tm=4096):
    """x: [B, STATE_DIM] f32. Params in PyTorch layout:
    w1 (HIDDEN, STATE_DIM), b1 (HIDDEN, 1), w2 (ACTION_DIM, HIDDEN), b2 (ACTION_DIM, 1).
    Returns softmax probabilities [B, ACTION_DIM]."""
    B = x.shape[0]
    xT = x.T                                           # [STATE_DIM, B]; cheap layout plumbing

    # Batch tile: lane-granular (multiple of 128). Large TM amortizes the
    # ~0.35 us per-grid-step pipeline overhead; cap it so the batch still
    # splits into >= 2 steps when possible (v7x: one step per TensorCore).
    # VMEM at TM=4096 (f32 hidden + double-buffered x/out blocks) is ~2.5 MiB,
    # far under every chip's scoped-VMEM limit.
    half = _round_up(max(1, (B + 1) // 2), 128)
    TM = max(128, min(tm, half))
    grid = (_round_up(B, TM) // TM,)                   # == cdiv(B, TM); partial block masked

    outT = pl.pallas_call(
        policy_kernel,
        out_shape=jax.ShapeDtypeStruct((ACTION_DIM, B), jnp.float32),
        grid=grid,
        in_specs=[
            pl.BlockSpec((STATE_DIM, TM), lambda i: (0, i)),       # xT: batch-tiled, lane-dense
            pl.BlockSpec((HIDDEN, STATE_DIM), lambda i: (0, 0)),   # w1: resident
            pl.BlockSpec((HIDDEN, 1), lambda i: (0, 0)),           # b1: resident
            pl.BlockSpec((ACTION_DIM, HIDDEN), lambda i: (0, 0)),  # w2: resident
            pl.BlockSpec((ACTION_DIM, 1), lambda i: (0, 0)),       # b2: resident
        ],
        out_specs=pl.BlockSpec((ACTION_DIM, TM), lambda i: (0, i)),
        compiler_params=pltpu.CompilerParams(
            # Independent batch tiles -> shard across TensorCores on v7x.
            dimension_semantics=("parallel",),
        ),
    )(xT, w1, b1, w2, b2)

    return outT.T                                      # [B, ACTION_DIM]


def init_params(key):
    # Deterministic synthetic init (uniform, roughly matching nn.Linear's scale),
    # stored in the native PyTorch layouts.
    k1, k2, k3, k4 = jax.random.split(key, 4)
    bound1 = 1.0 / jnp.sqrt(STATE_DIM)
    bound2 = 1.0 / jnp.sqrt(HIDDEN)
    w1 = jax.random.uniform(k1, (HIDDEN, STATE_DIM), jnp.float32, -bound1, bound1)
    b1 = jax.random.uniform(k2, (HIDDEN, 1), jnp.float32, -bound1, bound1)
    w2 = jax.random.uniform(k3, (ACTION_DIM, HIDDEN), jnp.float32, -bound2, bound2)
    b2 = jax.random.uniform(k4, (ACTION_DIM, 1), jnp.float32, -bound2, bound2)
    return w1, b1, w2, b2


def policy_ref(x, w1, b1, w2, b2):
    h = jnp.maximum(x @ w1.T + b1.T, 0.0)
    s = h @ w2.T + b2.T
    return jax.nn.softmax(s, axis=1)


if __name__ == "__main__":
    key = jax.random.PRNGKey(0)
    kx, kp = jax.random.split(key)

    batch = 8
    x = jax.random.normal(kx, (batch, STATE_DIM), jnp.float32)
    w1, b1, w2, b2 = init_params(kp)

    out = jax.block_until_ready(policy_forward(x, w1, b1, w2, b2))
    ref = policy_ref(x, w1, b1, w2, b2)

    assert out.shape == (batch, ACTION_DIM)
    assert jnp.allclose(out, ref, atol=1e-3, rtol=1e-3), "mismatch vs reference"
    # rows of the softmax sum to 1 (exact divide -> f32-level accuracy)
    assert jnp.allclose(jnp.sum(out, axis=1), jnp.ones((batch,)), atol=1e-5)

    print("KERNEL_OK")
</pallas_src>

<mosaic_0001>
module attributes {stable_mosaic.version = 11 : i64} {
  func.func @policy_kernel(%arg0: i32, %arg1: memref<2x128xf32, #tpu.memory_space<vmem>>, %arg2: memref<128x2xf32, #tpu.memory_space<vmem>>, %arg3: memref<128x1xf32, #tpu.memory_space<vmem>>, %arg4: memref<4x128xf32, #tpu.memory_space<vmem>>, %arg5: memref<4x1xf32, #tpu.memory_space<vmem>>, %arg6: memref<4x128xf32, #tpu.memory_space<vmem>>) attributes {dimension_semantics = [#tpu.dimension_semantics<parallel>], iteration_bounds = array<i64: 1>, scalar_prefetch = 0 : i64, scratch_operands = 0 : i64, tpu.core_type = #tpu.core_type<tc>, window_params = [{transform_indices = @transform_0, window_bounds = array<i64: 2, 128>}, {pipeline_mode = #tpu.pipeline_mode<synchronous>, transform_indices = @transform_1, window_bounds = array<i64: 128, 2>}, {pipeline_mode = #tpu.pipeline_mode<synchronous>, transform_indices = @transform_2, window_bounds = array<i64: 128, 1>}, {pipeline_mode = #tpu.pipeline_mode<synchronous>, transform_indices = @transform_3, window_bounds = array<i64: 4, 128>}, {pipeline_mode = #tpu.pipeline_mode<synchronous>, transform_indices = @transform_4, window_bounds = array<i64: 4, 1>}, {transform_indices = @transform_5, window_bounds = array<i64: 4, 128>}]} {
    %c0 = arith.constant 0 : index
    %c0_0 = arith.constant 0 : index
    %0 = vector.load %arg1[%c0, %c0_0] : memref<2x128xf32, #tpu.memory_space<vmem>>, vector<2x128xf32>
    %c0_1 = arith.constant 0 : index
    %c0_2 = arith.constant 0 : index
    %1 = vector.load %arg2[%c0_1, %c0_2] : memref<128x2xf32, #tpu.memory_space<vmem>>, vector<128x1xf32>
    %2 = vector.extract_strided_slice %0 {offsets = [0, 0], sizes = [1, 128], strides = [1, 1]} : vector<2x128xf32> to vector<1x128xf32>
    %3 = vector.broadcast %1 : vector<128x1xf32> to vector<128x128xf32>
    %4 = vector.broadcast %2 : vector<1x128xf32> to vector<128x128xf32>
    %5 = arith.mulf %3, %4 : vector<128x128xf32>
    %c0_3 = arith.constant 0 : index
    %c1 = arith.constant 1 : index
    %6 = vector.load %arg2[%c0_3, %c1] : memref<128x2xf32, #tpu.memory_space<vmem>>, vector<128x1xf32>
    %7 = vector.extract_strided_slice %0 {offsets = [1, 0], sizes = [1, 128], strides = [1, 1]} : vector<2x128xf32> to vector<1x128xf32>
    %8 = vector.broadcast %6 : vector<128x1xf32> to vector<128x128xf32>
    %9 = vector.broadcast %7 : vector<1x128xf32> to vector<128x128xf32>
    %10 = arith.mulf %8, %9 : vector<128x128xf32>
    %11 = arith.addf %5, %10 : vector<128x128xf32>
    %c0_4 = arith.constant 0 : index
    %c0_5 = arith.constant 0 : index
    %12 = vector.load %arg3[%c0_4, %c0_5] : memref<128x1xf32, #tpu.memory_space<vmem>>, vector<128x1xf32>
    %13 = vector.broadcast %12 : vector<128x1xf32> to vector<128x128xf32>
    %14 = arith.addf %11, %13 : vector<128x128xf32>
    %cst = arith.constant 0.000000e+00 : f32
    %15 = vector.broadcast %cst : f32 to vector<128x128xf32>
    %16 = arith.maximumf %14, %15 : vector<128x128xf32>
    %c0_6 = arith.constant 0 : index
    %c0_7 = arith.constant 0 : index
    %17 = vector.load %arg4[%c0_6, %c0_7] : memref<4x128xf32, #tpu.memory_space<vmem>>, vector<4x128xf32>
    %cst_8 = arith.constant dense<0.000000e+00> : vector<4x128xf32>
    %18 = tpu.matmul %17, %16, %cst_8 {dimension_numbers = #tpu.dot_dimension_numbers<[1], [0], [0], [1], [0, 0, 1, 1], [], []>} : vector<4x128xf32>, vector<128x128xf32>, vector<4x128xf32> -> vector<4x128xf32>
    %c0_9 = arith.constant 0 : index
    %c0_10 = arith.constant 0 : index
    %19 = vector.load %arg5[%c0_9, %c0_10] : memref<4x1xf32, #tpu.memory_space<vmem>>, vector<4x1xf32>
    %20 = vector.broadcast %19 : vector<4x1xf32> to vector<4x128xf32>
    %21 = arith.addf %18, %20 : vector<4x128xf32>
    %22 = vector.extract_strided_slice %21 {offsets = [0, 0], sizes = [1, 128], strides = [1, 1]} : vector<4x128xf32> to vector<1x128xf32>
    %23 = vector.extract_strided_slice %21 {offsets = [1, 0], sizes = [1, 128], strides = [1, 1]} : vector<4x128xf32> to vector<1x128xf32>
    %24 = arith.maximumf %22, %23 : vector<1x128xf32>
    %25 = vector.extract_strided_slice %21 {offsets = [2, 0], sizes = [1, 128], strides = [1, 1]} : vector<4x128xf32> to vector<1x128xf32>
    %26 = vector.extract_strided_slice %21 {offsets = [3, 0], sizes = [1, 128], strides = [1, 1]} : vector<4x128xf32> to vector<1x128xf32>
    %27 = arith.maximumf %25, %26 : vector<1x128xf32>
    %28 = arith.maximumf %24, %27 : vector<1x128xf32>
    %29 = vector.broadcast %28 : vector<1x128xf32> to vector<4x128xf32>
    %30 = arith.subf %21, %29 : vector<4x128xf32>
    %31 = math.exp %30 : vector<4x128xf32>
    %32 = vector.extract_strided_slice %31 {offsets = [0, 0], sizes = [1, 128], strides = [1, 1]} : vector<4x128xf32> to vector<1x128xf32>
    %33 = vector.extract_strided_slice %31 {offsets = [1, 0], sizes = [1, 128], strides = [1, 1]} : vector<4x128xf32> to vector<1x128xf32>
    %34 = arith.addf %32, %33 : vector<1x128xf32>
    %35 = vector.extract_strided_slice %31 {offsets = [2, 0], sizes = [1, 128], strides = [1, 1]} : vector<4x128xf32> to vector<1x128xf32>
    %36 = arith.addf %34, %35 : vector<1x128xf32>
    %37 = vector.extract_strided_slice %31 {offsets = [3, 0], sizes = [1, 128], strides = [1, 1]} : vector<4x128xf32> to vector<1x128xf32>
    %38 = arith.addf %36, %37 : vector<1x128xf32>
    %39 = vector.broadcast %38 : vector<1x128xf32> to vector<4x128xf32>
    %40 = arith.divf %31, %39 : vector<4x128xf32>
    %c0_11 = arith.constant 0 : index
    %c0_12 = arith.constant 0 : index
    %41 = vector.load %arg6[%c0_11, %c0_12] : memref<4x128xf32, #tpu.memory_space<vmem>>, vector<4x128xf32>
    tpu.vector_store %arg6[%c0_11, %c0_12], %40 {strides = array<i32>} : memref<4x128xf32, #tpu.memory_space<vmem>>, vector<4x128xf32>,
    return
  }
  func.func @transform_0(%arg0: i32) -> (i32, i32) {
    %c0_i32 = arith.constant 0 : i32
    %c0_i32_0 = arith.constant 0 : i32
    return %c0_i32, %arg0 : i32, i32
  }
  func.func @transform_1(%arg0: i32) -> (i32, i32) {
    %c0_i32 = arith.constant 0 : i32
    %c0_i32_0 = arith.constant 0 : i32
    %c0_i32_1 = arith.constant 0 : i32
    return %c0_i32, %c0_i32_0 : i32, i32
  }
  func.func @transform_2(%arg0: i32) -> (i32, i32) {
    %c0_i32 = arith.constant 0 : i32
    %c0_i32_0 = arith.constant 0 : i32
    %c0_i32_1 = arith.constant 0 : i32
    return %c0_i32, %c0_i32_0 : i32, i32
  }
  func.func @transform_3(%arg0: i32) -> (i32, i32) {
    %c0_i32 = arith.constant 0 : i32
    %c0_i32_0 = arith.constant 0 : i32
    %c0_i32_1 = arith.constant 0 : i32
    return %c0_i32, %c0_i32_0 : i32, i32
  }
  func.func @transform_4(%arg0: i32) -> (i32, i32) {
    %c0_i32 = arith.constant 0 : i32
    %c0_i32_0 = arith.constant 0 : i32
    %c0_i32_1 = arith.constant 0 : i32
    return %c0_i32, %c0_i32_0 : i32, i32
  }
  func.func @transform_5(%arg0: i32) -> (i32, i32) {
    %c0_i32 = arith.constant 0 : i32
    %c0_i32_0 = arith.constant 0 : i32
    return %c0_i32, %arg0 : i32, i32
  }
}

</mosaic_0001>

<bundles_post_ra>
// kernel: tpu_custom_call.1
= control target key start
LH: loop header
LB: loop body
LE: loop exit
PB: predicated region body
PF: predicated region fallthrough
CT: control target
= control target key end

     0   :  { %v617_v2 = vmov 1   ;;  %v618_v7 = vmov 0   ;;  %s856_s0 = inlined_call_operand.vmem [shape: f32[2,8], index: 0, kind: input, shape index: {}]   ;;  %s857_s1 = inlined_call_operand.vmem [shape: f32[128,2], index: 1, kind: input, shape index: {}]   ;;  %s858_s2 = inlined_call_operand.vmem [shape: f32[128,1], index: 2, kind: input, shape index: {}]   ;;  %s859_s3 = inlined_call_operand.vmem [shape: f32[4,128], index: 3, kind: input, shape index: {}]   ;;  %s860_s4 = inlined_call_operand.vmem [shape: f32[4,1], index: 4, kind: input, shape index: {}]   ;;  %s861_s5 = inlined_call_operand.hbm [shape: f32[4,8], index: 5, kind: output, shape index: {}]  }
   0x1   :  { %v24_v0 = vld [vmem:[%s857_s1 + $0x10] sm:$0xff]  ;;  %v22_v1 = vld [vmem:[%s857_s1] sm:$0xff]  ;;  %573 = vset.pattern.permute.xlu0 %v617_v2  ;;  %571 = vset.pattern.permute.xlu1 %v617_v2  ;;  %v23_v4 = vld [vmem:[%s857_s1 + $0x8] sm:$0xff] }
   0x2   :  { %147 = vperm.xlu0 %573, %v24_v0   ;;  %139 = vperm.xlu1 %571, %v22_v1   ;;  %v26_v3 = vld [vmem:[%s857_s1 + $0x20] sm:$0xff]  ;;  %v28_v5 = vld [vmem:[%s857_s1 + $0x30] sm:$0xff]  ;;  %v25_v6 = vld [vmem:[%s857_s1 + $0x18] sm:$0xff] }
   0x3   :  { %v30_v8 = vld [vmem:[%s857_s1 + $0x40] sm:$0xff] }
   0x6   :  { %155 = vperm.xlu0 %573, %v26_v3   ;;  %143 = vperm.xlu1 %571, %v23_v4  }
   0xa   :  { %163 = vperm.xlu0 %573, %v28_v5   ;;  %572 = vset.pattern.permute.xlu1 %v618_v7 }
   0xb   :  { %55 = vperm.xlu1 %572, %v25_v6  }
   0xc   :  { %10 = vsyncpa [#allocation3], 0  ;;  %v32_v9 = vld [vmem:[%s857_s1 + $0x50] sm:$0xff]  ;;  %v238_v10 = vld [vmem:[%s858_s2] sm:$0xff]  ;;  %v619_v19 = vmov 0.0|0.0   ;;  %vm620_vm0 = vmmov 0   ;;  %v118_v46 = vlaneseq }
   0xd   :  { %v34_v11 = vld [vmem:[%s857_s1 + $0x60] sm:$0xff]  ;;  %v691_v12 = vld [vmem:[%s857_s1 + $0x70] sm:$0xff]  ;;  %v27_v13 = vld [vmem:[%s857_s1 + $0x28] sm:$0xff]  ;;  %541 = vmatprep.subr.bf16.mxu0 %v619_v19  ;;  %v621_v44 = vmov 0.0  }
   0xe   :  { %171 = vperm.xlu0 %573, %v30_v8   ;;  %v240_v14 = vld [vmem:[%s858_s2 + $0x10] sm:$0xff]  ;;  %v239_v15 = vld [vmem:[%s858_s2 + $0x8] sm:$0xff]  ;;  %v241_v16 = vld [vmem:[%s858_s2 + $0x18] sm:$0xff]  ;;  %538 = vmatprep.mubr.msk.f32.mxu0 %vm620_vm0, %v621_v44  ;;  %v119_v49 = vshrl.u32 %v118_v46, 7 }
   0xf   :  { %574 = vset.pattern.permute.xlu1 %v617_v2  ;;  %v29_v17 = vld [vmem:[%s857_s1 + $0x38] sm:$0xff]  ;;  %v243_v18 = vld [vmem:[%s858_s2 + $0x28] sm:$0xff]  ;;  %v242_v21 = vld [vmem:[%s858_s2 + $0x20] sm:$0xff] }
  0x10   :  { %151 = vperm.xlu1 %574, %v25_v6   ;;  %v245_v20 = vld [vmem:[%s858_s2 + $0x38] sm:$0xff]  ;;  %v247_v22 = vld [vmem:[%s858_s2 + $0x48] sm:$0xff]  ;;  %v367_v26 = vld [vmem:[%s860_s4] sm:$0xf]  ;;  %v204_v52 = vsub.s32 1, %v119_v49  ;;  %v785_v53 = vsub.s32 0, %v119_v49 }
  0x11   :  { %v249_v23 = vld [vmem:[%s858_s2 + $0x58] sm:$0xff]  ;;  %v31_v24 = vld [vmem:[%s857_s1 + $0x48] sm:$0xff]  ;;  %v244_v27 = vld [vmem:[%s858_s2 + $0x30] sm:$0xff] }
  0x12   :  { %179 = vperm.xlu0 %573, %v32_v9   ;;  %v251_v25 = vld [vmem:[%s858_s2 + $0x68] sm:$0xff]  ;;  %v33_v28 = vld [vmem:[%s857_s1 + $0x58] sm:$0xff]  ;;  %v246_v29 = vld [vmem:[%s858_s2 + $0x40] sm:$0xff] }
  0x13   :  { %v35_v30 = vld [vmem:[%s857_s1 + $0x68] sm:$0xff]  ;;  %v248_v31 = vld [vmem:[%s858_s2 + $0x50] sm:$0xff]  ;;  %v37_v32 = vld [vmem:[%s857_s1 + $0x78] sm:$0xff] }
  0x14   :  { %575 = vset.pattern.permute.xlu1 %v618_v7  ;;  %v250_v33 = vld [vmem:[%s858_s2 + $0x60] sm:$0xff]  ;;  %v252_v36 = vld [vmem:[%s858_s2 + $0x70] sm:$0xff]  ;;  %v253_v39 = vld [vmem:[%s858_s2 + $0x78] sm:$0xff] }
  0x15   :  { %256 = vperm.xlu1 %575, %v238_v10   ;;  %v21_v54 = vld [vmem:[%s856_s0] sm:$0x3] }
  0x16   :  { %187 = vperm.xlu0 %573, %v34_v11   ;;  %v790_v57 = vrot.slane %v21_v54, %v204_v52  ;;  %v793_v58 = vrot.slane %v21_v54, %v785_v53 }
  0x19   :  { %60 = vperm.xlu1 %575, %v26_v3  }
  0x1a   :  { %195 = vperm.xlu0 %573, %v691_v12  }
  0x1d   :  { %65 = vperm.xlu1 %575, %v27_v13  }
  0x1e   :  { %586 = vset.pattern.permute.xlu0 %v618_v7 }
  0x1f   :  { %40 = vperm.xlu0 %586, %v22_v1  }
  0x21   :  { %576 = vset.pattern.permute.xlu1 %v617_v2 }
  0x22   :  { %159 = vperm.xlu1 %576, %v27_v13  }
  0x23   :  { %45 = vperm.xlu0 %586, %v23_v4  }
  0x26   :  { %577 = vset.pattern.permute.xlu1 %v618_v7 }
  0x27   :  { %50 = vperm.xlu0 %586, %v24_v0   ;;  %266 = vperm.xlu1 %577, %v240_v14  }
  0x2b   :  { %261 = vperm.xlu0 %586, %v239_v15   ;;  %70 = vperm.xlu1 %577, %v28_v5  }
  0x2f   :  { %271 = vperm.xlu0 %586, %v241_v16   ;;  %75 = vperm.xlu1 %577, %v29_v17  }
  0x33   :  { %281 = vperm.xlu0 %586, %v243_v18   ;;  %578 = vset.pattern.permute.xlu1 %v617_v2 }
  0x34   :  { %167 = vperm.xlu1 %578, %v29_v17  }
  0x37   :  { %291 = vperm.xlu0 %586, %v245_v20  }
  0x38   :  { %579 = vset.pattern.permute.xlu1 %v618_v7 }
  0x39   :  { %276 = vperm.xlu1 %579, %v242_v21  }
  0x3b   :  { %301 = vperm.xlu0 %586, %v247_v22  }
  0x3d   :  { %80 = vperm.xlu1 %579, %v30_v8  }
  0x3f   :  { %311 = vperm.xlu0 %586, %v249_v23  }
  0x41   :  { %85 = vperm.xlu1 %579, %v31_v24  }
  0x43   :  { %321 = vperm.xlu0 %586, %v251_v25  }
  0x45   :  { %580 = vset.pattern.permute.xlu1 %v617_v2 }
  0x46   :  { %175 = vperm.xlu1 %580, %v31_v24  }
  0x47   :  { %370 = vperm.xlu0 %586, %v367_v26  }
  0x4a   :  { %581 = vset.pattern.permute.xlu1 %v618_v7 }
  0x4b   :  { %286 = vperm.xlu1 %581, %v244_v27  }
  0x4f   :  { %90 = vperm.xlu1 %581, %v32_v9  }
  0x53   :  { %95 = vperm.xlu1 %581, %v33_v28  }
  0x57   :  { %582 = vset.pattern.permute.xlu1 %v617_v2 }
  0x58   :  { %183 = vperm.xlu1 %582, %v33_v28  }
  0x5c   :  { %583 = vset.pattern.permute.xlu1 %v618_v7 }
  0x5d   :  { %296 = vperm.xlu1 %583, %v246_v29  }
  0x61   :  { %100 = vperm.xlu1 %583, %v34_v11  }
  0x65   :  { %105 = vperm.xlu1 %583, %v35_v30  }
  0x69   :  { %584 = vset.pattern.permute.xlu1 %v617_v2 }
  0x6a   :  { %191 = vperm.xlu1 %584, %v35_v30  }
  0x6e   :  { %585 = vset.pattern.permute.xlu1 %v618_v7 }
  0x6f   :  { %306 = vperm.xlu1 %585, %v248_v31  }
  0x73   :  { %110 = vperm.xlu1 %585, %v691_v12  }
  0x77   :  { %115 = vperm.xlu1 %585, %v37_v32  }
  0x7b   :  { %587 = vset.pattern.permute.xlu1 %v617_v2 }
  0x7c   :  { %199 = vperm.xlu1 %587, %v37_v32  }
  0x80   :  { %588 = vset.pattern.permute.xlu1 %v618_v7 }
  0x81   :  { %316 = vperm.xlu1 %588, %v250_v33   ;;  %v140_v34 = vpop.permute.xlu1 %139  ;;  %v148_v35 = vpop.permute.xlu0 %147 }
  0x82   :  { %v206_v62 = vmul.f32 %v790_v57, %v140_v34  ;;  %v208_v63 = vmul.f32 %v790_v57, %v148_v35 }
  0x85   :  { %326 = vperm.xlu1 %588, %v252_v36   ;;  %v144_v37 = vpop.permute.xlu1 %143  ;;  %v156_v38 = vpop.permute.xlu0 %155 }
  0x86   :  { %v207_v4 = vmul.f32 %v790_v57, %v144_v37  ;;  %v210_v26 = vmul.f32 %v790_v57, %v156_v38 }
  0x89   :  { %331 = vperm.xlu1 %588, %v253_v39   ;;  %v775_v40 = vpop.permute.xlu0 %163 }
  0x8a   :  { %v56_v41 = vpop.permute.xlu1 %55 }
  0x8b   :  { %v125_v12 = vmul.f32 %v793_v58, %v56_v41 }
  0x8d   :  { %v777_v42 = vpop.permute.xlu0 %171 }
  0x8f   :  { %v152_v43 = vpop.permute.xlu1 %151 }
  0x90   :  { %v209_v6 = vmul.f32 %v790_v57, %v152_v43 }
  0x91   :  { %v779_v45 = vpop.permute.xlu0 %179 }
  0x92   :  { %v225_v16 = vadd.f32 %v209_v6, %v125_v12 }
  0x94   :  { %v257_v47 = vpop.permute.xlu1 %256 }
  0x95   :  { %v781_v48 = vpop.permute.xlu0 %187 }
  0x98   :  { %v61_v50 = vpop.permute.xlu1 %60 }
  0x99   :  { %v783_v51 = vpop.permute.xlu0 %195  ;;  %v126_v27 = vmul.f32 %v793_v58, %v61_v50 }
  0x9b   :  { %v226_v34 = vadd.f32 %v210_v26, %v126_v27 }
  0x9c   :  { %v66_v55 = vpop.permute.xlu1 %65 }
  0x9d   :  { %v127_v28 = vmul.f32 %v793_v58, %v66_v55 }
  0x9e   :  { %v41_v56 = vpop.permute.xlu0 %40 }
  0x9f   :  { %v122_v59 = vmul.f32 %v793_v58, %v41_v56 }
  0xa1   :  { %v160_v60 = vpop.permute.xlu1 %159  ;;  %v222_v0 = vadd.f32 %v206_v62, %v122_v59 }
  0xa2   :  { %v46_v61 = vpop.permute.xlu0 %45  ;;  %v211_v23 = vmul.f32 %v790_v57, %v160_v60 }
  0xa3   :  { %v123_v1 = vmul.f32 %v793_v58, %v46_v61  ;;  %v334_v9 = vadd.f32 %v257_v47, %v222_v0  ;;  %v212_v47 = vmul.f32 %v790_v57, %v775_v40 }
  0xa4   :  { %v227_v32 = vadd.f32 %v211_v23, %v127_v28 }
  0xa5   :  { %v223_v8 = vadd.f32 %v207_v4, %v123_v1  ;;  %v350_v17 = vmax.f32 %v334_v9, 0.0 }
  0xa6   :  { %v51_v2 = vpop.permute.xlu0 %50  ;;  %v267_v3 = vpop.permute.xlu1 %266 }
  0xa7   :  { %v124_v5 = vmul.f32 %v793_v58, %v51_v2 }
  0xa9   :  { %v224_v7 = vadd.f32 %v208_v63, %v124_v5 }
  0xaa   :  { %v262_v10 = vpop.permute.xlu0 %261  ;;  %v71_v11 = vpop.permute.xlu1 %70 }
  0xab   :  { %v335_v13 = vadd.f32 %v262_v10, %v223_v8  ;;  %v336_v14 = vadd.f32 %v267_v3, %v224_v7  ;;  %v128_v49 = vmul.f32 %v793_v58, %v71_v11  ;;  %v214_v3 = vmul.f32 %v790_v57, %v777_v42 }
  0xad   :  { %v351_v15 = vmax.f32 %v335_v13, 0.0  ;;  %v352_v24 = vmax.f32 %v336_v14, 0.0  ;;  %v228_v56 = vadd.f32 %v212_v47, %v128_v49  ;;  %v220_v47 = vmul.f32 %v790_v57, %v783_v51  ;;  %v366_v51 = vld [vmem:[%s859_s3] sm:$0xf]  ;;  %s622_s3 = smov [#allocation2]  }
  0xae   :  { %v272_v18 = vpop.permute.xlu0 %271  ;;  %v76_v20 = vpop.permute.xlu1 %75  ;;  %s481_s9 = sshll.u32 %s622_s3, 4  ;;  %s482_s9 = int_to_ptr.vmem [resolvable:$true] %s481_s9 }
  0xaf   :  { %v337_v21 = vadd.f32 %v272_v18, %v225_v16  ;;  %v542_v22 = vpack.c.bf16 %v351_v15, %v350_v17  ;;  %v129_v46 = vmul.f32 %v793_v58, %v76_v20  ;;  %s593_s10 = scalar_lea.vmem %s482_s9, 64  ;;  %p598_p1 = scmp.lt.s32.totalorder %s482_s9, %s482_s9 }
  0xb0   :  { %p594_p0 = scmp.ne.s32.totalorder %s482_s9, %s593_s10  ;;  %p599_p2 = scmp.lt.s32.totalorder %s593_s10, %s593_s10 }
  0xb1   :  { %v353_v25 = vmax.f32 %v337_v21, 0.0  ;;  %543 = vmatpush3.bf16.msra.mxu0 %v542_v22  ;;  %v216_v22 = vmul.f32 %v790_v57, %v779_v45 }
  0xb2   :  { %544 = vmatprep.subr.bf16.mxu0 %v619_v19  ;;  %v282_v31 = vpop.permute.xlu0 %281  ;;  %p600_p3 = por %p599_p2, %p598_p1 }
  0xb3   :  { %v545_v29 = vpack.c.bf16 %v353_v25, %v352_v24  ;;  %v168_v30 = vpop.permute.xlu1 %167  ;;  %v339_v33 = vadd.f32 %v282_v31, %v227_v32 }
  0xb4   :  { %v213_v44 = vmul.f32 %v790_v57, %v168_v30  ;;  %p601_p4 = pnand %p600_p3, %p594_p0 }
  0xb5   :  { %546 = vmatpush3.bf16.msra.mxu0 %v545_v29  ;;  %v355_v37 = vmax.f32 %v339_v33, 0.0 }
  0xb6   :  { %547 = vmatprep.subr.bf16.mxu0 %v619_v19  ;;  %v229_v50 = vadd.f32 %v213_v44, %v129_v46  ;;  %v292_v54 = vpop.permute.xlu0 %291 }
  0xb8   :  { %v277_v35 = vpop.permute.xlu1 %276  ;;  %v341_v55 = vadd.f32 %v292_v54, %v229_v50 }
  0xb9   :  { %v338_v36 = vadd.f32 %v277_v35, %v226_v34 }
  0xba   :  { %v357_v61 = vmax.f32 %v341_v55, 0.0  ;;  %v302_v7 = vpop.permute.xlu0 %301 }
  0xbb   :  { %v354_v39 = vmax.f32 %v338_v36, 0.0 }
  0xbc   :  { %v81_v41 = vpop.permute.xlu1 %80 }
  0xbd   :  { %v548_v43 = vpack.c.bf16 %v355_v37, %v354_v39  ;;  %v130_v4 = vmul.f32 %v793_v58, %v81_v41  ;;  %v218_v37 = vmul.f32 %v790_v57, %v781_v48 }
  0xbe   :  { %v312_v23 = vpop.permute.xlu0 %311 }
  0xbf   :  { %549 = vmatpush3.bf16.msra.mxu0 %v548_v43  ;;  %v230_v9 = vadd.f32 %v214_v3, %v130_v4 }
  0xc0   :  { %v86_v38 = vpop.permute.xlu1 %85  ;;  %550 = vmatprep.subr.bf16.mxu0 %v619_v19 }
  0xc1   :  { %v131_v40 = vmul.f32 %v793_v58, %v86_v38 }
  0xc2   :  { %v322_v39 = vpop.permute.xlu0 %321 }
  0xc5   :  { %v176_v52 = vpop.permute.xlu1 %175 }
  0xc6   :  { %v215_v2 = vmul.f32 %v790_v57, %v176_v52 }
  0xc8   :  { %v231_v5 = vadd.f32 %v215_v2, %v131_v40 }
  0xca   :  { %v287_v59 = vpop.permute.xlu1 %286  ;;  %v343_v8 = vadd.f32 %v302_v7, %v231_v5 }
  0xcb   :  { %v340_v60 = vadd.f32 %v287_v59, %v228_v56 }
  0xcc   :  { %v359_v12 = vmax.f32 %v343_v8, 0.0 }
  0xcd   :  { %v356_v62 = vmax.f32 %v340_v60, 0.0 }
  0xce   :  { %v91_v63 = vpop.permute.xlu1 %90 }
  0xcf   :  { %v551_v0 = vpack.c.bf16 %v357_v61, %v356_v62  ;;  %v132_v18 = vmul.f32 %v793_v58, %v91_v63 }
  0xd1   :  { %552 = vmatpush3.bf16.msra.mxu0 %v551_v0  ;;  %v232_v25 = vadd.f32 %v216_v22, %v132_v18 }
  0xd2   :  { %v96_v1 = vpop.permute.xlu1 %95  ;;  %553 = vmatprep.subr.bf16.mxu0 %v619_v19 }
  0xd3   :  { %v133_v42 = vmul.f32 %v793_v58, %v96_v1 }
  0xd7   :  { %v184_v6 = vpop.permute.xlu1 %183 }
  0xd8   :  { %v217_v17 = vmul.f32 %v790_v57, %v184_v6 }
  0xda   :  { %v233_v20 = vadd.f32 %v217_v17, %v133_v42 }
  0xdc   :  { %v297_v10 = vpop.permute.xlu1 %296  ;;  %v345_v24 = vadd.f32 %v312_v23, %v233_v20 }
  0xdd   :  { %v342_v11 = vadd.f32 %v297_v10, %v230_v9 }
  0xde   :  { %v361_v28 = vmax.f32 %v345_v24, 0.0 }
  0xdf   :  { %v358_v13 = vmax.f32 %v342_v11, 0.0 }
  0xe0   :  { %v101_v14 = vpop.permute.xlu1 %100 }
  0xe1   :  { %v554_v15 = vpack.c.bf16 %v359_v12, %v358_v13  ;;  %v134_v35 = vmul.f32 %v793_v58, %v101_v14 }
  0xe3   :  { %555 = vmatpush3.bf16.msra.mxu0 %v554_v15  ;;  %v234_v43 = vadd.f32 %v218_v37, %v134_v35 }
  0xe4   :  { %v106_v16 = vpop.permute.xlu1 %105  ;;  %556 = vmatprep.subr.bf16.mxu0 %v619_v19 }
  0xe5   :  { %v135_v34 = vmul.f32 %v793_v58, %v106_v16 }
  0xe9   :  { %v192_v21 = vpop.permute.xlu1 %191 }
  0xea   :  { %v219_v33 = vmul.f32 %v790_v57, %v192_v21 }
  0xec   :  { %v235_v45 = vadd.f32 %v219_v33, %v135_v34 }
  0xee   :  { %v307_v26 = vpop.permute.xlu1 %306  ;;  %v347_v41 = vadd.f32 %v322_v39, %v235_v45 }
  0xef   :  { %v344_v27 = vadd.f32 %v307_v26, %v232_v25 }
  0xf0   :  { %v363_v52 = vmax.f32 %v347_v41, 0.0 }
  0xf1   :  { %v360_v29 = vmax.f32 %v344_v27, 0.0 }
  0xf2   :  { %v111_v30 = vpop.permute.xlu1 %110 }
  0xf3   :  { %v557_v31 = vpack.c.bf16 %v361_v28, %v360_v29  ;;  %v136_v44 = vmul.f32 %v793_v58, %v111_v30 }
  0xf5   :  { %558 = vmatpush3.bf16.msra.mxu0 %v557_v31  ;;  %v236_v59 = vadd.f32 %v220_v47, %v136_v44 }
  0xf6   :  { %v116_v32 = vpop.permute.xlu1 %115  ;;  %559 = vmatprep.subr.bf16.mxu0 %v619_v19 }
  0xf7   :  { %v137_v55 = vmul.f32 %v793_v58, %v116_v32 }
  0xfb   :  { %v200_v36 = vpop.permute.xlu1 %199 }
  0xfc   :  { %v221_v49 = vmul.f32 %v790_v57, %v200_v36  ;;  %v371_v57 = vpop.permute.xlu0 %370 }
  0xfe   :  { %v237_v60 = vadd.f32 %v221_v49, %v137_v55 }
 0x100   :  { %v317_v38 = vpop.permute.xlu1 %316 }
 0x101   :  { %v346_v46 = vadd.f32 %v317_v38, %v234_v43 }
 0x103   :  { %v362_v50 = vmax.f32 %v346_v46, 0.0 }
 0x104   :  { %v327_v54 = vpop.permute.xlu1 %326 }
 0x105   :  { %v560_v56 = vpack.c.bf16 %v363_v52, %v362_v50  ;;  %v348_v48 = vadd.f32 %v327_v54, %v236_v59 }
 0x107   :  { %561 = vmatpush3.bf16.msra.mxu0 %v560_v56  ;;  %v364_v63 = vmax.f32 %v348_v48, 0.0 }
 0x108   :  { %v332_v61 = vpop.permute.xlu1 %331  ;;  %562 = vmatprep.subr.bf16.mxu0 %v619_v19 }
 0x109   :  { %v349_v62 = vadd.f32 %v332_v61, %v237_v60 }
 0x10b   :  { %v365_v0 = vmax.f32 %v349_v62, 0.0 }
 0x10d   :  { %v563_v1 = vpack.c.bf16 %v365_v0, %v364_v63 }
 0x10f   :  { %564 = vmatpush3.bf16.msra.mxu0 %v563_v1 }
 0x112   :  { %539 = vmatmul.mubr.f32.vlgmr.msra.gmra.mrb[0].mxu0 %v366_v51 }
 0x1e5   :  { %v439_v58 = vpop.f32.mrb[0].mxu0 }
 0x1e6   :  { %v440_v2 = vadd.f32 %v439_v58, %v371_v57  ;;  %v540_v40 = vpop.f32.mrb[1].mxu0 }
 0x1e8   :  { %v444_v3 = vrot.slane %v440_v2, 1 }
 0x1ea   :  { %v446_v4 = vmax.f32 %v440_v2, %v444_v3 }
 0x1ec   :  { %v448_v5 = vrot.slane %v446_v4, 2 }
 0x1ee   :  { %v450_v6 = vmax.f32 %v446_v4, %v448_v5 }
 0x1f0   :  { %v454_v19 = vrot.slane %v450_v6, %v785_v53 }
 0x1f2   :  { %v455_v7 = vsub.f32 %v440_v2, %v454_v19 }
 0x1f4   :  { %v456_v8 = vmul.f32 1.442695, %v455_v7 }
 0x1f6   :  { %589 = vpow2.f32 %v456_v8 }
 0x200   :  { %v590_v9 = vpop.eup %589 }
 0x201   :  { %v459_v10 = vrot.slane %v590_v9, 1  ;;  %v462_v12 = vrot.slane %v590_v9, 2  ;;  %v465_v14 = vrot.slane %v590_v9, 3 }
 0x203   :  { %v461_v11 = vadd.f32 %v590_v9, %v459_v10 }
 0x205   :  { %v464_v13 = vadd.f32 %v462_v12, %v461_v11 }
 0x207   :  { %v467_v15 = vadd.f32 %v465_v14, %v464_v13 }
 0x209   :  { %v471_v16 = vrot.slane %v467_v15, %v785_v53 }
 0x20b   :  { %591 = vrcp.f32 %v471_v16 }
 0x215   :  { %v592_v17 = vpop.eup %591 }
 0x216   :  { %v473_v42 = vmul.f32 %v592_v17, %v590_v9 }
 0x218   :  { %474 = vst [vmem:[#allocation2] sm:$0xf] %v473_v42 }
 0x219   :  { %604 = shalt.err (!%p601_p4)
}
 0x21a   :  { %s605_s13 = scalar_lea.hbm %s861_s5, 64 }
 0x21b   :  { %p606_p5 = scmp.ne.s32.totalorder %s861_s5, %s605_s13  ;;  %p609_p6 = scmp.lt.u32.totalorder %s605_s13, %s861_s5 }
 0x21d   :  { %p611_p7 = pnand %p609_p6, %p606_p5 }
 0x21f   :  { %614 = shalt.err (!%p611_p7)
}
 0x220   :  { %484 = dma.vmem_to_hbm [thread:$0]  %s482_s9, 64, %s861_s5, [#allocation3]  }
 0x221   :  { %615 = dma.done.wait [#allocation3], 64  }
 0x222   :  { %616 = vsyncadd [#allocation3], 4294967232 }
 0x223   :  { %488 = vsyncpa [#allocation3], 1 }

</bundles_post_ra>
